<compile_context>
chip_gen: v6e
topology: v6e:2x2x1
jax: 0.10.0
libtpu: 0.0.40
codegen_flags: <defaults>
</compile_context>

<pallas_src>
import functools

import jax
import jax.numpy as jnp
from jax.experimental import pallas as pl
from jax.experimental.pallas import tpu as pltpu


def _round_up(n, m):
    return ((n + m - 1) // m) * m


def _default_tile_and_vmem():
    """Generation-aware defaults: bigger tiles on 128-MiB-VMEM chips (v5e/v6e),
    conservative on v7x (64 MiB per TensorCore)."""
    try:
        vmem_cap = pltpu.get_tpu_info().vmem_capacity_bytes
    except Exception:  # non-TPU backend / old runtime: use conservative values
        vmem_cap = 64 * 1024 * 1024
    if vmem_cap >= 100 * 1024 * 1024:          # v5e / v6e (128 MiB physical)
        return 1024, 64 * 1024 * 1024
    return 512, 32 * 1024 * 1024               # v7x (64 MiB per TC)


_DEFAULT_BATCH_TILE, _DEFAULT_VMEM_LIMIT = _default_tile_and_vmem()


def _const_spec(shape):
    """BlockSpec for a grid-invariant (resident) block. Requests single
    buffering (pl.Buffered(1)) so weights aren't double-buffered; falls back to
    the default spec if this JAX build doesn't support pipeline_mode."""
    index_map = lambda i: (0, 0)
    try:
        return pl.BlockSpec(shape, index_map, pipeline_mode=pl.Buffered(1))
    except Exception:
        return pl.BlockSpec(shape, index_map)


def _classifier_kernel(x_ref, w1_ref, b1_ref, w2_ref, b2_ref, w3_ref, b3_ref,
                       out_ref):
    # In-kernel f32 -> bf16 cast (VPU, hidden under MXU); avoids a separate
    # wrapper-side pad/convert HBM pass for the activations.
    x = x_ref[...].astype(jnp.bfloat16)                            # (tb, Kp)

    # Layer 1: Linear + ReLU (+ Dropout == identity in eval). f32 accumulate.
    h1 = jnp.dot(x, w1_ref[...], preferred_element_type=jnp.float32)
    h1 = jnp.maximum(h1 + b1_ref[...], 0.0)

    # Layer 2: Linear + ReLU (+ Dropout == identity in eval).
    h2 = jnp.dot(h1.astype(jnp.bfloat16), w2_ref[...],
                 preferred_element_type=jnp.float32)
    h2 = jnp.maximum(h2 + b2_ref[...], 0.0)

    # Layer 3: Linear + Sigmoid.
    h3 = jnp.dot(h2.astype(jnp.bfloat16), w3_ref[...],
                 preferred_element_type=jnp.float32)
    h3 = h3 + b3_ref[...]
    # sigmoid(z) = 1 / (1 + exp(-z)); exp + approx reciprocal both ride the EUP.
    out_ref[...] = pl.reciprocal(1.0 + jnp.exp(-h3), approx=True).astype(
        out_ref.dtype)


def prepare_params(params):
    """One-time prep: zero-pad all feature dims to 128 lanes and cast weights to
    bf16 (biases stay f32). Cache the result and reuse it for every forward call.

    Weights are (in_features, out_features): y = x @ W + b
    (== PyTorch's y = x @ W.T + b with W of shape (out, in)).
    """
    def pad2(a, rows, cols, dtype):
        a = jnp.asarray(a)
        return jnp.pad(a, ((0, rows - a.shape[0]),
                           (0, cols - a.shape[1]))).astype(dtype)

    input_dim, H1 = params["w1"].shape
    H2 = params["w2"].shape[1]
    NC = params["w3"].shape[1]
    Kp, H1p, H2p, NCp = (_round_up(d, 128) for d in (input_dim, H1, H2, NC))

    prepared = {
        "w1": pad2(params["w1"], Kp, H1p, jnp.bfloat16),
        "b1": pad2(params["b1"], 1, H1p, jnp.float32),
        "w2": pad2(params["w2"], H1p, H2p, jnp.bfloat16),
        "b2": pad2(params["b2"], 1, H2p, jnp.float32),
        "w3": pad2(params["w3"], H2p, NCp, jnp.bfloat16),
        "b3": pad2(params["b3"], 1, NCp, jnp.float32),
    }
    return prepared


@functools.partial(
    jax.jit,
    static_argnames=("num_classes", "batch_tile", "vmem_limit_bytes",
                     "out_dtype", "return_padded"))
def classifier_forward(x, prepared, *, num_classes,
                       batch_tile=_DEFAULT_BATCH_TILE,
                       vmem_limit_bytes=_DEFAULT_VMEM_LIMIT,
                       out_dtype=jnp.bfloat16,
                       return_padded=False):
    """x: (B, input_dim) f32. prepared: output of prepare_params (cached)."""
    B, input_dim = x.shape
    Kp, H1p = prepared["w1"].shape
    H2p = prepared["w2"].shape[1]
    NCp = prepared["w3"].shape[1]

    # Batch tile: multiple of 8 sublanes; only split the grid when each tile
    # still gets >= 128 rows (otherwise a single step — no pointless overhead).
    Br = _round_up(B, 8)
    tb = min(batch_tile, Br)
    if Br >= 256:
        tb = min(tb, _round_up(pl.cdiv(Br, 2), 8))
    tb = max(8, _round_up(tb, 8))
    Bp = _round_up(B, tb)
    grid = (Bp // tb,)

    # Pad x (zeros) only if needed; keep f32 — bf16 cast happens in-kernel.
    if (Bp, Kp) != (B, input_dim):
        x = jnp.pad(x, ((0, Bp - B), (0, Kp - input_dim)))

    in_specs = [
        pl.BlockSpec((tb, Kp), lambda i: (i, 0)),    # x tile (pipelined)
        _const_spec((Kp, H1p)),                      # w1 (resident, 1 buffer)
        _const_spec((1, H1p)),                       # b1
        _const_spec((H1p, H2p)),                     # w2
        _const_spec((1, H2p)),                       # b2
        _const_spec((H2p, NCp)),                     # w3
        _const_spec((1, NCp)),                       # b3
    ]
    out_spec = pl.BlockSpec((tb, NCp), lambda i: (i, 0))   # lane-dense output

    out_bytes = jnp.dtype(out_dtype).itemsize
    flops = 2 * Bp * (Kp * H1p + H1p * H2p + H2p * NCp)
    bytes_accessed = (
        Bp * Kp * 4                                              # x (f32) in
        + 2 * (prepared["w1"].size + prepared["w2"].size + prepared["w3"].size)
        + 4 * (prepared["b1"].size + prepared["b2"].size + prepared["b3"].size)
        + Bp * NCp * out_bytes)                                  # output
    cost = pl.CostEstimate(flops=flops,
                           transcendentals=2 * Bp * NCp,
                           bytes_accessed=bytes_accessed)

    out_padded = pl.pallas_call(
        _classifier_kernel,
        out_shape=jax.ShapeDtypeStruct((Bp, NCp), out_dtype),
        grid_spec=pltpu.PrefetchScalarGridSpec(
            num_scalar_prefetch=0,
            grid=grid,
            in_specs=in_specs,
            out_specs=out_spec,
        ),
        compiler_params=pltpu.CompilerParams(
            dimension_semantics=("parallel",),
            vmem_limit_bytes=vmem_limit_bytes,
        ),
        cost_estimate=cost,
    )(x, prepared["w1"], prepared["b1"], prepared["w2"], prepared["b2"],
      prepared["w3"], prepared["b3"])

    if return_padded:
        # Downstream can consume the padded (Bp, NCp) slab directly and avoid
        # an extra slice pass.
        return out_padded
    return out_padded[:B, :num_classes]


def init_params(key, input_dim, hidden_dim, num_classes):
    """Deterministic init mimicking PyTorch's Kaiming-uniform Linear defaults."""
    dims = [(input_dim, hidden_dim),
            (hidden_dim, hidden_dim // 2),
            (hidden_dim // 2, num_classes)]
    params = {}
    for idx, (fan_in, fan_out) in enumerate(dims, start=1):
        key, kw, kb = jax.random.split(key, 3)
        bound = 1.0 / jnp.sqrt(fan_in)
        params[f"w{idx}"] = jax.random.uniform(
            kw, (fan_in, fan_out), jnp.float32, -bound, bound)
        params[f"b{idx}"] = jax.random.uniform(
            kb, (1, fan_out), jnp.float32, -bound, bound)
    return params


def classifier_ref(x, p):
    """Reference with the same bf16-operand / f32-accumulate numerics."""
    bf = jnp.bfloat16
    h = jnp.dot(x.astype(bf), p["w1"].astype(bf),
                preferred_element_type=jnp.float32) + p["b1"]
    h = jnp.maximum(h, 0.0)
    h = jnp.dot(h.astype(bf), p["w2"].astype(bf),
                preferred_element_type=jnp.float32) + p["b2"]
    h = jnp.maximum(h, 0.0)
    logits = jnp.dot(h.astype(bf), p["w3"].astype(bf),
                     preferred_element_type=jnp.float32) + p["b3"]
    return jax.nn.sigmoid(logits)


if __name__ == "__main__":
    key = jax.random.PRNGKey(0)
    B, input_dim, hidden_dim, num_classes = 16, 32, 32, 4

    key, kx = jax.random.split(key)
    x = jax.random.normal(kx, (B, input_dim), jnp.float32)
    params = init_params(key, input_dim, hidden_dim, num_classes)

    # One-time weight prep (padded + bf16-cast), cached across forward calls.
    prepared = jax.tree_util.tree_map(jax.block_until_ready,
                                      prepare_params(params))

    # Small batch: single grid step (split is gated off below 256 rows).
    out = classifier_forward(x, prepared, num_classes=num_classes)
    out = jax.block_until_ready(out)
    ref = classifier_ref(x, params)
    assert out.shape == (B, num_classes)
    err = float(jnp.max(jnp.abs(out.astype(jnp.float32) - ref)))
    assert err < 2e-2, err

    # Larger batch: exercises the multi-step pipelined grid + resident weights.
    B2 = 512
    key, kx2 = jax.random.split(key)
    x2 = jax.random.normal(kx2, (B2, input_dim), jnp.float32)
    out2 = jax.block_until_ready(
        classifier_forward(x2, prepared, num_classes=num_classes))
    ref2 = classifier_ref(x2, params)
    assert out2.shape == (B2, num_classes)
    err2 = float(jnp.max(jnp.abs(out2.astype(jnp.float32) - ref2)))
    assert err2 < 2e-2, err2

    print("KERNEL_OK")
</pallas_src>

<mosaic_0001>
module attributes {stable_mosaic.version = 11 : i64} {
  func.func @_classifier_kernel(%arg0: i32, %arg1: memref<16x128xf32, #tpu.memory_space<vmem>>, %arg2: memref<128x128xbf16, #tpu.memory_space<vmem>>, %arg3: memref<1x128xf32, #tpu.memory_space<vmem>>, %arg4: memref<128x128xbf16, #tpu.memory_space<vmem>>, %arg5: memref<1x128xf32, #tpu.memory_space<vmem>>, %arg6: memref<128x128xbf16, #tpu.memory_space<vmem>>, %arg7: memref<1x128xf32, #tpu.memory_space<vmem>>, %arg8: memref<16x128xbf16, #tpu.memory_space<vmem>>) attributes {dimension_semantics = [#tpu.dimension_semantics<parallel>], iteration_bounds = array<i64: 1>, scalar_prefetch = 0 : i64, scratch_operands = 0 : i64, tpu.core_type = #tpu.core_type<tc>, window_params = [{transform_indices = @transform_0, window_bounds = array<i64: 16, 128>}, {pipeline_mode = #tpu.pipeline_mode<synchronous>, transform_indices = @transform_1, window_bounds = array<i64: 128, 128>}, {pipeline_mode = #tpu.pipeline_mode<synchronous>, transform_indices = @transform_2, window_bounds = array<i64: 1, 128>}, {pipeline_mode = #tpu.pipeline_mode<synchronous>, transform_indices = @transform_3, window_bounds = array<i64: 128, 128>}, {pipeline_mode = #tpu.pipeline_mode<synchronous>, transform_indices = @transform_4, window_bounds = array<i64: 1, 128>}, {pipeline_mode = #tpu.pipeline_mode<synchronous>, transform_indices = @transform_5, window_bounds = array<i64: 128, 128>}, {pipeline_mode = #tpu.pipeline_mode<synchronous>, transform_indices = @transform_6, window_bounds = array<i64: 1, 128>}, {transform_indices = @transform_7, window_bounds = array<i64: 16, 128>}]} {
    %c0 = arith.constant 0 : index
    %c0_0 = arith.constant 0 : index
    %0 = vector.load %arg1[%c0, %c0_0] : memref<16x128xf32, #tpu.memory_space<vmem>>, vector<16x128xf32>
    %1 = arith.truncf %0 : vector<16x128xf32> to vector<16x128xbf16>
    %c0_1 = arith.constant 0 : index
    %c0_2 = arith.constant 0 : index
    %2 = vector.load %arg2[%c0_1, %c0_2] : memref<128x128xbf16, #tpu.memory_space<vmem>>, vector<128x128xbf16>
    %cst = arith.constant dense<0.000000e+00> : vector<16x128xf32>
    %3 = tpu.matmul %1, %2, %cst {dimension_numbers = #tpu.dot_dimension_numbers<[1], [0], [0], [1], [0, 0, 1, 1], [], []>} : vector<16x128xbf16>, vector<128x128xbf16>, vector<16x128xf32> -> vector<16x128xf32>
    %c0_3 = arith.constant 0 : index
    %c0_4 = arith.constant 0 : index
    %4 = vector.load %arg3[%c0_3, %c0_4] : memref<1x128xf32, #tpu.memory_space<vmem>>, vector<1x128xf32>
    %5 = vector.broadcast %4 : vector<1x128xf32> to vector<16x128xf32>
    %6 = arith.addf %3, %5 : vector<16x128xf32>
    %cst_5 = arith.constant 0.000000e+00 : f32
    %7 = vector.broadcast %cst_5 : f32 to vector<16x128xf32>
    %8 = arith.maximumf %6, %7 : vector<16x128xf32>
    %9 = arith.truncf %8 : vector<16x128xf32> to vector<16x128xbf16>
    %c0_6 = arith.constant 0 : index
    %c0_7 = arith.constant 0 : index
    %10 = vector.load %arg4[%c0_6, %c0_7] : memref<128x128xbf16, #tpu.memory_space<vmem>>, vector<128x128xbf16>
    %cst_8 = arith.constant dense<0.000000e+00> : vector<16x128xf32>
    %11 = tpu.matmul %9, %10, %cst_8 {dimension_numbers = #tpu.dot_dimension_numbers<[1], [0], [0], [1], [0, 0, 1, 1], [], []>} : vector<16x128xbf16>, vector<128x128xbf16>, vector<16x128xf32> -> vector<16x128xf32>
    %c0_9 = arith.constant 0 : index
    %c0_10 = arith.constant 0 : index
    %12 = vector.load %arg5[%c0_9, %c0_10] : memref<1x128xf32, #tpu.memory_space<vmem>>, vector<1x128xf32>
    %13 = vector.broadcast %12 : vector<1x128xf32> to vector<16x128xf32>
    %14 = arith.addf %11, %13 : vector<16x128xf32>
    %cst_11 = arith.constant 0.000000e+00 : f32
    %15 = vector.broadcast %cst_11 : f32 to vector<16x128xf32>
    %16 = arith.maximumf %14, %15 : vector<16x128xf32>
    %17 = arith.truncf %16 : vector<16x128xf32> to vector<16x128xbf16>
    %c0_12 = arith.constant 0 : index
    %c0_13 = arith.constant 0 : index
    %18 = vector.load %arg6[%c0_12, %c0_13] : memref<128x128xbf16, #tpu.memory_space<vmem>>, vector<128x128xbf16>
    %cst_14 = arith.constant dense<0.000000e+00> : vector<16x128xf32>
    %19 = tpu.matmul %17, %18, %cst_14 {dimension_numbers = #tpu.dot_dimension_numbers<[1], [0], [0], [1], [0, 0, 1, 1], [], []>} : vector<16x128xbf16>, vector<128x128xbf16>, vector<16x128xf32> -> vector<16x128xf32>
    %c0_15 = arith.constant 0 : index
    %c0_16 = arith.constant 0 : index
    %20 = vector.load %arg7[%c0_15, %c0_16] : memref<1x128xf32, #tpu.memory_space<vmem>>, vector<1x128xf32>
    %21 = vector.broadcast %20 : vector<1x128xf32> to vector<16x128xf32>
    %22 = arith.addf %19, %21 : vector<16x128xf32>
    %cst_17 = arith.constant 0.000000e+00 : f32
    %23 = vector.broadcast %cst_17 : f32 to vector<16x128xf32>
    %24 = arith.subf %23, %22 : vector<16x128xf32>
    %25 = math.exp %24 : vector<16x128xf32>
    %cst_18 = arith.constant 1.000000e+00 : f32
    %26 = vector.broadcast %cst_18 : f32 to vector<16x128xf32>
    %27 = arith.addf %26, %25 : vector<16x128xf32>
    %28 = tpu.reciprocal %27 {approx = true} : vector<16x128xf32> -> vector<16x128xf32>
    %29 = arith.truncf %28 : vector<16x128xf32> to vector<16x128xbf16>
    %c0_19 = arith.constant 0 : index
    %c0_20 = arith.constant 0 : index
    %30 = vector.load %arg8[%c0_19, %c0_20] : memref<16x128xbf16, #tpu.memory_space<vmem>>, vector<16x128xbf16>
    tpu.vector_store %arg8[%c0_19, %c0_20], %29 {strides = array<i32>} : memref<16x128xbf16, #tpu.memory_space<vmem>>, vector<16x128xbf16>,
    return
  }
  func.func @transform_0(%arg0: i32) -> (i32, i32) {
    %c0_i32 = arith.constant 0 : i32
    %c0_i32_0 = arith.constant 0 : i32
    return %arg0, %c0_i32 : i32, i32
  }
  func.func @transform_1(%arg0: i32) -> (i32, i32) {
    %c0_i32 = arith.constant 0 : i32
    %c0_i32_0 = arith.constant 0 : i32
    %c0_i32_1 = arith.constant 0 : i32
    return %c0_i32, %c0_i32_0 : i32, i32
  }
  func.func @transform_2(%arg0: i32) -> (i32, i32) {
    %c0_i32 = arith.constant 0 : i32
    %c0_i32_0 = arith.constant 0 : i32
    %c0_i32_1 = arith.constant 0 : i32
    return %c0_i32, %c0_i32_0 : i32, i32
  }
  func.func @transform_3(%arg0: i32) -> (i32, i32) {
    %c0_i32 = arith.constant 0 : i32
    %c0_i32_0 = arith.constant 0 : i32
    %c0_i32_1 = arith.constant 0 : i32
    return %c0_i32, %c0_i32_0 : i32, i32
  }
  func.func @transform_4(%arg0: i32) -> (i32, i32) {
    %c0_i32 = arith.constant 0 : i32
    %c0_i32_0 = arith.constant 0 : i32
    %c0_i32_1 = arith.constant 0 : i32
    return %c0_i32, %c0_i32_0 : i32, i32
  }
  func.func @transform_5(%arg0: i32) -> (i32, i32) {
    %c0_i32 = arith.constant 0 : i32
    %c0_i32_0 = arith.constant 0 : i32
    %c0_i32_1 = arith.constant 0 : i32
    return %c0_i32, %c0_i32_0 : i32, i32
  }
  func.func @transform_6(%arg0: i32) -> (i32, i32) {
    %c0_i32 = arith.constant 0 : i32
    %c0_i32_0 = arith.constant 0 : i32
    %c0_i32_1 = arith.constant 0 : i32
    return %c0_i32, %c0_i32_0 : i32, i32
  }
  func.func @transform_7(%arg0: i32) -> (i32, i32) {
    %c0_i32 = arith.constant 0 : i32
    %c0_i32_0 = arith.constant 0 : i32
    return %arg0, %c0_i32 : i32, i32
  }
}

</mosaic_0001>

<bundles_post_ra>
// kernel: classifier_forward.1
= control target key start
LH: loop header
LB: loop body
LE: loop exit
PB: predicated region body
PF: predicated region fallthrough
CT: control target
= control target key end

     0   :  { %12 = vsyncpa [#allocation3], 0  ;;  %s769_s0 = inlined_call_operand.vmem [shape: f32[16,128], index: 0, kind: input, shape index: {}]   ;;  %s770_s1 = inlined_call_operand.hbm [shape: bf16[128,128], index: 1, kind: input, shape index: {}]   ;;  %s771_s2 = inlined_call_operand.vmem [shape: f32[1,128], index: 2, kind: input, shape index: {}]   ;;  %s772_s3 = inlined_call_operand.hbm [shape: bf16[128,128], index: 3, kind: input, shape index: {}]   ;;  %s773_s4 = inlined_call_operand.vmem [shape: f32[1,128], index: 4, kind: input, shape index: {}]   ;;  %s774_s5 = inlined_call_operand.hbm [shape: bf16[128,128], index: 5, kind: input, shape index: {}]   ;;  %s775_s6 = inlined_call_operand.vmem [shape: f32[1,128], index: 6, kind: input, shape index: {}]   ;;  %s776_s7 = inlined_call_operand.vmem [shape: bf16[16,128], index: 7, kind: output, shape index: {}]  }
   0x1   :  { %13 = vsyncpa [#allocation5], 0  ;;  %s665_s24 = smov [#allocation4]   ;;  %s666_s26 = smov [#allocation2]  }
   0x2   :  { %s35_s25 = sshll.u32 %s665_s24, 4  ;;  %s21_s27 = sshll.u32 %s666_s26, 4  ;;  %s36_s25 = int_to_ptr.vmem [resolvable:$true] %s35_s25  ;;  %s22_s27 = int_to_ptr.vmem [resolvable:$true] %s21_s27 }
   0x3   :  { %s609_s28 = scalar_lea.vmem %s36_s25, 1024  ;;  %p614_p1 = scmp.lt.s32.totalorder %s36_s25, %s36_s25 }
   0x4   :  { %p610_p0 = scmp.ne.s32.totalorder %s36_s25, %s609_s28  ;;  %p615_p2 = scmp.lt.s32.totalorder %s609_s28, %s609_s28 }
   0x6   :  { %p616_p3 = por %p615_p2, %p614_p1 }
   0x8   :  { %p617_p4 = pnand %p616_p3, %p610_p0 }
   0xa   :  { %620 = shalt.err (!%p617_p4)
}
   0xb   :  { %s667_s29 = smov 64   ;;  %s668_s30 = smov 4  }
   0xc   :  { %41 = dma.hbm_to_vmem [thread:$0]  %s772_s3, 1024, %s36_s25, [#allocation5], %s667_s29, %s667_s29, %s668_s30  }
   0xd   :  { %s629_s10 = scalar_lea.vmem %s22_s27, 1024  ;;  %p634_p6 = scmp.lt.s32.totalorder %s22_s27, %s22_s27 }
   0xe   :  { %p630_p5 = scmp.ne.s32.totalorder %s22_s27, %s629_s10  ;;  %p635_p7 = scmp.lt.s32.totalorder %s629_s10, %s629_s10 }
  0x10   :  { %p636_p8 = por %p635_p7, %p634_p6 }
  0x12   :  { %p637_p9 = pnand %p636_p8, %p630_p5 }
  0x14   :  { %640 = shalt.err (!%p637_p9)
}
  0x15   :  { %27 = dma.hbm_to_vmem [thread:$0]  %s770_s1, 1024, %s22_s27, [#allocation3], %s667_s29, %s667_s29, %s668_s30  }
  0x16   :  { %s669_s13 = smov [#allocation6]  }
  0x17   :  { %s49_s14 = sshll.u32 %s669_s13, 4  ;;  %s50_s14 = int_to_ptr.vmem [resolvable:$true] %s49_s14 }
  0x18   :  { %s649_s15 = scalar_lea.vmem %s50_s14, 1024  ;;  %p654_p11 = scmp.lt.s32.totalorder %s50_s14, %s50_s14 }
  0x19   :  { %p650_p10 = scmp.ne.s32.totalorder %s50_s14, %s649_s15  ;;  %p655_p12 = scmp.lt.s32.totalorder %s649_s15, %s649_s15 }
  0x1b   :  { %p656_p13 = por %p655_p12, %p654_p11 }
  0x1d   :  { %p657_p0 = pnand %p656_p13, %p650_p10 }
  0x1f   :  { %660 = shalt.err (!%p657_p0)
}
  0x20   :  { %55 = dma.hbm_to_vmem [thread:$0]  %s774_s5, 1024, %s50_s14, [#allocation5], %s667_s29, %s667_s29, %s668_s30  }
  0x21   :  { %661 = dma.done.wait [#allocation3], 1024  }
  0x22   :  { %662 = vsyncadd [#allocation3], 4294966272 }
  0x23   :  { %663 = dma.done.wait [#allocation5], 2048  }
  0x24   :  { %664 = vsyncadd [#allocation5], 4294965248  ;;  %v670_v0 = vmov 0.0   ;;  %vm671_vm0 = vmmov 0   ;;  %v569_v1 = vld [vmem:[#allocation2 + $0x38] sm:$0xff]   ;;  %v570_v2 = vld [vmem:[#allocation2 + $0x30] sm:$0xff]  }
  0x25   :  { %502 = vmatprep.subr.bf16.mxu0 %v670_v0  ;;  %518 = vmatprep.mubr.msk.bf16.mxu0 %vm671_vm0, %v670_v0  ;;  %v571_v3 = vld [vmem:[#allocation2 + $0x28] sm:$0xff]   ;;  %v577_v4 = vld [vmem:[#allocation4 + $0x38] sm:$0xff]   ;;  %v572_v5 = vld [vmem:[#allocation2 + $0x20] sm:$0xff]  }
  0x26   :  { %522 = vmatprep.subr.bf16.mxu1 %v670_v0  ;;  %538 = vmatprep.mubr.msk.bf16.mxu1 %vm671_vm0, %v670_v0  ;;  %v578_v6 = vld [vmem:[#allocation4 + $0x30] sm:$0xff]   ;;  %v573_v7 = vld [vmem:[#allocation2 + $0x18] sm:$0xff]   ;;  %v579_v8 = vld [vmem:[#allocation4 + $0x28] sm:$0xff]  }
  0x27   :  { %503 = vmatpush3.bf16.msra.mxu0 %v569_v1  ;;  %523 = vmatpush3.bf16.msra.mxu1 %v577_v4  ;;  %v574_v9 = vld [vmem:[#allocation2 + $0x10] sm:$0xff]   ;;  %v580_v10 = vld [vmem:[#allocation4 + $0x20] sm:$0xff]   ;;  %v575_v11 = vld [vmem:[#allocation2 + $0x8] sm:$0xff]  }
  0x28   :  { %504 = vmatprep.subr.bf16.mxu0 %v670_v0  ;;  %524 = vmatprep.subr.bf16.mxu1 %v670_v0  ;;  %v581_v12 = vld [vmem:[#allocation4 + $0x18] sm:$0xff]   ;;  %v576_v13 = vld [vmem:[#allocation2] sm:$0xff]   ;;  %v69_v15 = vld [vmem:[%s769_s0 + $0x8] sm:$0xff] }
  0x29   :  { %v68_v14 = vld [vmem:[%s769_s0] sm:$0xff]  ;;  %v582_v17 = vld [vmem:[#allocation4 + $0x10] sm:$0xff]   ;;  %v583_v18 = vld [vmem:[#allocation4 + $0x8] sm:$0xff]  }
  0x2a   :  { %v70_v16 = vpack.c.bf16 %v69_v15, %v68_v14  ;;  %v584_v19 = vld [vmem:[#allocation4] sm:$0xff]   ;;  %v585_v20 = vld [vmem:[#allocation6 + $0x38] sm:$0xff]   ;;  %v586_v21 = vld [vmem:[#allocation6 + $0x30] sm:$0xff]  }
  0x2b   :  { %505 = vmatpush3.bf16.msra.mxu0 %v570_v2  ;;  %525 = vmatpush3.bf16.msra.mxu1 %v578_v6  ;;  %v587_v22 = vld [vmem:[#allocation6 + $0x28] sm:$0xff]   ;;  %v588_v23 = vld [vmem:[#allocation6 + $0x20] sm:$0xff]   ;;  %v589_v24 = vld [vmem:[#allocation6 + $0x18] sm:$0xff]  }
  0x2c   :  { %506 = vmatprep.subr.bf16.mxu0 %v670_v0  ;;  %526 = vmatprep.subr.bf16.mxu1 %v670_v0  ;;  %v439_v25 = vld [vmem:[%s771_s2] ss:$0 sm:$0xff]  ;;  %v590_v35 = vld [vmem:[#allocation6 + $0x10] sm:$0xff]   ;;  %v591_v36 = vld [vmem:[#allocation6 + $0x8] sm:$0xff]  }
  0x2d   :  { %v592_v37 = vld [vmem:[#allocation6] sm:$0xff]  }
  0x2e   :  { %v448_v38 = vld [vmem:[%s773_s4] ss:$0 sm:$0xff] }
  0x2f   :  { %507 = vmatpush3.bf16.msra.mxu0 %v571_v3  ;;  %527 = vmatpush3.bf16.msra.mxu1 %v579_v8  ;;  %v457_v48 = vld [vmem:[%s775_s6] ss:$0 sm:$0xff] }
  0x30   :  { %508 = vmatprep.subr.bf16.mxu0 %v670_v0  ;;  %528 = vmatprep.subr.bf16.mxu1 %v670_v0 }
  0x33   :  { %509 = vmatpush3.bf16.msra.mxu0 %v572_v5  ;;  %529 = vmatpush3.bf16.msra.mxu1 %v580_v10 }
  0x34   :  { %510 = vmatprep.subr.bf16.mxu0 %v670_v0  ;;  %530 = vmatprep.subr.bf16.mxu1 %v670_v0 }
  0x37   :  { %511 = vmatpush3.bf16.msra.mxu0 %v573_v7  ;;  %531 = vmatpush3.bf16.msra.mxu1 %v581_v12 }
  0x38   :  { %512 = vmatprep.subr.bf16.mxu0 %v670_v0  ;;  %532 = vmatprep.subr.bf16.mxu1 %v670_v0 }
  0x3b   :  { %513 = vmatpush3.bf16.msra.mxu0 %v574_v9  ;;  %533 = vmatpush3.bf16.msra.mxu1 %v582_v17 }
  0x3c   :  { %514 = vmatprep.subr.bf16.mxu0 %v670_v0  ;;  %534 = vmatprep.subr.bf16.mxu1 %v670_v0 }
  0x3f   :  { %515 = vmatpush3.bf16.msra.mxu0 %v575_v11  ;;  %535 = vmatpush3.bf16.msra.mxu1 %v583_v18 }
  0x40   :  { %516 = vmatprep.subr.bf16.mxu0 %v670_v0  ;;  %536 = vmatprep.subr.bf16.mxu1 %v670_v0 }
  0x43   :  { %517 = vmatpush3.bf16.msra.mxu0 %v576_v13  ;;  %537 = vmatpush3.bf16.msra.mxu1 %v584_v19 }
  0x44   :  { %542 = vmatprep.subr.bf16.mxu0 %v670_v0 }
  0x46   :  { %519 = vmatmul.mubr.bf16.vlgmr.msra.gmra.mxu0 %v70_v16 }
  0x47   :  { %558 = vmatprep.mubr.msk.bf16.mxu0 %vm671_vm0, %v670_v0  ;;  %543 = vmatpush3.bf16.msra.mxu0 %v585_v20 }
  0x48   :  { %544 = vmatprep.subr.bf16.mxu0 %v670_v0 }
  0x4b   :  { %545 = vmatpush3.bf16.msra.mxu0 %v586_v21 }
  0x4c   :  { %546 = vmatprep.subr.bf16.mxu0 %v670_v0 }
  0x4f   :  { %547 = vmatpush3.bf16.msra.mxu0 %v587_v22 }
  0x50   :  { %548 = vmatprep.subr.bf16.mxu0 %v670_v0 }
  0x53   :  { %549 = vmatpush3.bf16.msra.mxu0 %v588_v23 }
  0x54   :  { %550 = vmatprep.subr.bf16.mxu0 %v670_v0 }
  0x57   :  { %551 = vmatpush3.bf16.msra.mxu0 %v589_v24 }
  0x58   :  { %552 = vmatprep.subr.bf16.mxu0 %v670_v0 }
  0x5b   :  { %553 = vmatpush3.bf16.msra.mxu0 %v590_v35 }
  0x5c   :  { %554 = vmatprep.subr.bf16.mxu0 %v670_v0 }
  0x5f   :  { %555 = vmatpush3.bf16.msra.mxu0 %v591_v36 }
  0x60   :  { %556 = vmatprep.subr.bf16.mxu0 %v670_v0 }
  0x63   :  { %557 = vmatpush3.bf16.msra.mxu0 %v592_v37 }
 0x106   :  { %v176_v26 = vpop.f32.mrf.mxu0 }
 0x107   :  { %v177_v28 = vadd.f32 %v439_v25, %v176_v26 }
 0x108   :  { %v520_v27 = vpop.f32.mrf.mxu0 }
 0x109   :  { %v183_v32 = vmax.f32 %v177_v28, 0.0 }
 0x10a   :  { %v179_v29 = vpop.f32.mrf.mxu0 }
 0x10b   :  { %v180_v30 = vadd.f32 %v439_v25, %v179_v29 }
 0x10c   :  { %v521_v31 = vpop.f32.mrf.mxu0 }
 0x10d   :  { %v184_v33 = vmax.f32 %v180_v30, 0.0 }
 0x10f   :  { %v185_v34 = vpack.c.bf16 %v184_v33, %v183_v32 }
 0x111   :  { %539 = vmatmul.mubr.bf16.vlgmr.msra.gmra.mxu1 %v185_v34 }
 0x1d1   :  { %v291_v39 = vpop.f32.mrf.mxu1 }
 0x1d2   :  { %v292_v41 = vadd.f32 %v448_v38, %v291_v39 }
 0x1d3   :  { %v540_v40 = vpop.f32.mrf.mxu1 }
 0x1d4   :  { %v298_v45 = vmax.f32 %v292_v41, 0.0 }
 0x1d5   :  { %v294_v42 = vpop.f32.mrf.mxu1 }
 0x1d6   :  { %v295_v43 = vadd.f32 %v448_v38, %v294_v42 }
 0x1d7   :  { %v541_v44 = vpop.f32.mrf.mxu1 }
 0x1d8   :  { %v299_v46 = vmax.f32 %v295_v43, 0.0 }
 0x1da   :  { %v300_v47 = vpack.c.bf16 %v299_v46, %v298_v45 }
 0x1dc   :  { %559 = vmatmul.mubr.bf16.vlgmr.msra.gmra.mxu0 %v300_v47 }
 0x29c   :  { %v406_v49 = vpop.f32.mrf.mxu0 }
 0x29d   :  { %v407_v50 = vadd.f32 %v457_v48, %v406_v49 }
 0x29e   :  { %v560_v51 = vpop.f32.mrf.mxu0 }
 0x29f   :  { %v413_v52 = vsub.f32 0.0, %v407_v50 }
 0x2a0   :  { %v409_v53 = vpop.f32.mrf.mxu0 }
 0x2a1   :  { %v415_v54 = vmul.f32 1.442695, %v413_v52  ;;  %v410_v55 = vadd.f32 %v457_v48, %v409_v53 }
 0x2a2   :  { %v561_v56 = vpop.f32.mrf.mxu0 }
 0x2a3   :  { %593 = vpow2.f32 %v415_v54  ;;  %v414_v57 = vsub.f32 0.0, %v410_v55 }
 0x2a5   :  { %v417_v58 = vmul.f32 1.442695, %v414_v57 }
 0x2a7   :  { %595 = vpow2.f32 %v417_v58 }
 0x2b0   :  { %v594_v59 = vpop.eup %593 }
 0x2b1   :  { %v419_v60 = vadd.f32 1.0, %v594_v59 }
 0x2b3   :  { %597 = vrcp.f32 %v419_v60 }
 0x2b4   :  { %v596_v61 = vpop.eup %595 }
 0x2b5   :  { %v420_v62 = vadd.f32 1.0, %v596_v61 }
 0x2b7   :  { %599 = vrcp.f32 %v420_v62 }
 0x2c0   :  { %v598_v63 = vpop.eup %597 }
 0x2c4   :  { %v600_v0 = vpop.eup %599 }
 0x2c5   :  { %v473_v1 = vpack.c.bf16 %v600_v0, %v598_v63 }
 0x2c7   :  { %474 = vst [vmem:[%s776_s7] sm:$0xff] %v473_v1  }
 0x2c8   :  { %437 = vsyncpa [#allocation3], 1 }
 0x2c9   :  { %438 = vsyncpa [#allocation5], 1 }

</bundles_post_ra>
